<compile_context>
chip_gen: v7x
topology: tpu7x:2x2x1
jax: 0.10.0
libtpu: 0.0.40
codegen_flags: <defaults>
</compile_context>

<pallas_src>
import functools

import jax
import jax.numpy as jnp
from jax.experimental import pallas as pl
from jax.experimental.pallas import tpu as pltpu


def _round_up(n: int, m: int) -> int:
    return ((n + m - 1) // m) * m


def _hloss_kernel(x_ref, o_ref, acc_ref, *, block_b: int, blocks_per_split: int,
                  total_rows: int):
    i = pl.program_id(0)      # batch split (parallel; maps to separate TCs on v7x)
    j = pl.program_id(1)      # streaming / reduction axis within the split

    @pl.when(j == 0)
    def _():
        acc_ref[...] = jnp.zeros_like(acc_ref)

    x = x_ref[...].astype(jnp.float32)                    # (block_b, C)
    m = jnp.max(x, axis=1, keepdims=True)                 # (block_b, 1)
    z = x - m
    ez = jnp.exp(z)
    s = jnp.sum(ez, axis=1, keepdims=True)                # sum exp(z)
    t = jnp.sum(ez * z, axis=1, keepdims=True)            # sum z * exp(z)
    # entropy(row) = log(s) - t / s  (== -sum softmax * log_softmax); one
    # per-row divide only, keeps full f32 precision.
    ent = jnp.log(s) - t / s                              # (block_b, 1)

    # Mask rows past the true batch (partial last tile / clamped tail blocks).
    row0 = (i * blocks_per_split + j) * block_b
    rows = row0 + jax.lax.broadcasted_iota(jnp.int32, (block_b, 1), 0)
    ent = jnp.where(rows < total_rows, ent, 0.0)

    acc_ref[...] += ent                                   # per-row partial sums (VMEM)

    @pl.when(j == pl.num_programs(1) - 1)
    def _():
        # One cross-lane/sublane reduce per split, off the steady-state path.
        o_ref[...] = jnp.full(o_ref.shape, jnp.sum(acc_ref[...]), dtype=o_ref.dtype)


def hloss(x: jax.Array, *, max_block_rows: int = 1024,
          vmem_tile_budget_bytes: int = 4 * 1024 * 1024,
          num_splits: int = 2) -> jax.Array:
    """Entropy loss: mean_b( -sum_c softmax(x)_bc * log_softmax(x)_bc )."""
    B, C = x.shape

    # Largest multiple-of-8 row tile whose f32 tile fits the per-buffer budget
    # (keeps double-buffered input + live f32 intermediates inside the v7x
    # 32 MiB scoped VMEM; v5e/v6e have more headroom).
    rows_fit = max(8, (vmem_tile_budget_bytes // (C * 4)) // 8 * 8)
    block_b = int(min(max_block_rows, rows_fit, _round_up(B, 8)))

    total_blocks = pl.cdiv(B, block_b)
    num_splits = int(min(num_splits, total_blocks))
    blocks_per_split = pl.cdiv(total_blocks, num_splits)

    def x_index_map(i, j):
        blk = i * blocks_per_split + j
        # Clamp tail iterations of the last split onto a valid block; their
        # logical rows are masked out in the kernel, so they contribute 0.
        return (jnp.minimum(blk, total_blocks - 1), 0)

    out = pl.pallas_call(
        functools.partial(_hloss_kernel, block_b=block_b,
                          blocks_per_split=blocks_per_split, total_rows=B),
        out_shape=jax.ShapeDtypeStruct((num_splits, 8, 128), jnp.float32),
        grid_spec=pltpu.PrefetchScalarGridSpec(
            num_scalar_prefetch=0,
            grid=(num_splits, blocks_per_split),
            in_specs=[pl.BlockSpec((block_b, C), x_index_map)],
            out_specs=pl.BlockSpec((1, 8, 128), lambda i, j: (i, 0, 0)),
            scratch_shapes=[pltpu.VMEM((block_b, 1), jnp.float32)],
        ),
        compiler_params=pltpu.CompilerParams(
            dimension_semantics=("parallel", "arbitrary"),
            vmem_limit_bytes=32 * 1024 * 1024,
        ),
    )(x)

    # Sum the (at most 2) per-split partials and take the batch mean.
    return jnp.sum(out[:, 0, 0]) / jnp.float32(B)


def _hloss_ref(x: jax.Array) -> jax.Array:
    xf = x.astype(jnp.float32)
    p = jax.nn.softmax(xf, axis=1)
    logp = jax.nn.log_softmax(xf, axis=1)
    return jnp.mean(-jnp.sum(p * logp, axis=1))


if __name__ == "__main__":
    key = jax.random.PRNGKey(0)

    # Case 1: small lane-aligned logits (batch=16, classes=128), default tiling
    # (single block, single split).
    x1 = jax.random.normal(key, (16, 128), dtype=jnp.float32)
    out1 = jax.block_until_ready(hloss(x1))
    ref1 = _hloss_ref(x1)
    assert jnp.allclose(out1, ref1, atol=1e-5, rtol=1e-5), (out1, ref1)

    # Case 2: exercises multi-block streaming, the 2-way (megacore) split and the
    # masked partial / clamped tail blocks (batch=40 with a forced 16-row tile).
    x2 = jax.random.normal(jax.random.PRNGKey(0), (40, 128), dtype=jnp.float32)
    out2 = jax.block_until_ready(hloss(x2, max_block_rows=16))
    ref2 = _hloss_ref(x2)
    assert jnp.allclose(out2, ref2, atol=1e-5, rtol=1e-5), (out2, ref2)

    print("KERNEL_OK")
</pallas_src>

<mosaic_0001>
module attributes {stable_mosaic.version = 11 : i64} {
  func.func @_hloss_kernel(%arg0: i32, %arg1: i32, %arg2: memref<16x128xf32, #tpu.memory_space<vmem>>, %arg3: memref<1x8x128xf32, #tpu.memory_space<vmem>>, %arg4: memref<16x1xf32, #tpu.memory_space<vmem>>) attributes {dimension_semantics = [#tpu.dimension_semantics<parallel>, #tpu.dimension_semantics<arbitrary>], iteration_bounds = array<i64: 1, 1>, scalar_prefetch = 0 : i64, scratch_operands = 1 : i64, tpu.core_type = #tpu.core_type<tc>, window_params = [{transform_indices = @transform_0, window_bounds = array<i64: 16, 128>}, {transform_indices = @transform_1, window_bounds = array<i64: 1, 8, 128>}]} {
    %c0_i32 = arith.constant 0 : i32
    %0 = arith.cmpi eq, %arg1, %c0_i32 : i32
    %1 = arith.extui %0 : i1 to i32
    %c0_i32_0 = arith.constant 0 : i32
    %2 = arith.cmpi ne, %1, %c0_i32_0 : i32
    scf.if %2 {
      %cst_12 = arith.constant 0.000000e+00 : f32
      %33 = vector.broadcast %cst_12 : f32 to vector<16x1xf32>
      %c0_13 = arith.constant 0 : index
      %c0_14 = arith.constant 0 : index
      %34 = vector.load %arg4[%c0_13, %c0_14] : memref<16x1xf32, #tpu.memory_space<vmem>>, vector<16x1xf32>
      tpu.vector_store %arg4[%c0_13, %c0_14], %33 {strides = array<i32>} : memref<16x1xf32, #tpu.memory_space<vmem>>, vector<16x1xf32>,
    } else {
    }
    %c0 = arith.constant 0 : index
    %c0_1 = arith.constant 0 : index
    %3 = vector.load %arg2[%c0, %c0_1] : memref<16x128xf32, #tpu.memory_space<vmem>>, vector<16x128xf32>
    %cst = arith.constant dense<0xFF800000> : vector<16xf32>
    %4 = vector.multi_reduction <maximumf>, %3, %cst [1] : vector<16x128xf32> to vector<16xf32>
    %5 = vector.shape_cast %4 : vector<16xf32> to vector<16x1xf32>
    %6 = vector.broadcast %5 : vector<16x1xf32> to vector<16x128xf32>
    %7 = arith.subf %3, %6 : vector<16x128xf32>
    %8 = math.exp %7 : vector<16x128xf32>
    %cst_2 = arith.constant dense<0.000000e+00> : vector<16xf32>
    %9 = vector.multi_reduction <add>, %8, %cst_2 [1] : vector<16x128xf32> to vector<16xf32>
    %10 = vector.shape_cast %9 : vector<16xf32> to vector<16x1xf32>
    %11 = arith.mulf %8, %7 : vector<16x128xf32>
    %cst_3 = arith.constant dense<0.000000e+00> : vector<16xf32>
    %12 = vector.multi_reduction <add>, %11, %cst_3 [1] : vector<16x128xf32> to vector<16xf32>
    %13 = vector.shape_cast %12 : vector<16xf32> to vector<16x1xf32>
    %14 = math.log %10 : vector<16x1xf32>
    %15 = arith.divf %13, %10 : vector<16x1xf32>
    %16 = arith.subf %14, %15 : vector<16x1xf32>
    %c1_i32 = arith.constant 1 : i32
    %17 = arith.muli %arg0, %c1_i32 : i32
    %18 = arith.addi %17, %arg1 : i32
    %c16_i32 = arith.constant 16 : i32
    %19 = arith.muli %18, %c16_i32 : i32
    %20 = tpu.iota {dimensions = array<i32: 0>} : vector<16x1xi32>
    %21 = vector.broadcast %19 : i32 to vector<16x1xi32>
    %22 = arith.addi %21, %20 : vector<16x1xi32>
    %c16_i32_4 = arith.constant 16 : i32
    %23 = vector.broadcast %c16_i32_4 : i32 to vector<16x1xi32>
    %24 = arith.cmpi slt, %22, %23 : vector<16x1xi32>
    %cst_5 = arith.constant 0.000000e+00 : f32
    %25 = vector.broadcast %cst_5 : f32 to vector<16x1xf32>
    %26 = arith.select %24, %16, %25 : vector<16x1xi1>, vector<16x1xf32>
    %c0_6 = arith.constant 0 : index
    %c0_7 = arith.constant 0 : index
    %27 = vector.load %arg4[%c0_6, %c0_7] : memref<16x1xf32, #tpu.memory_space<vmem>>, vector<16x1xf32>
    %28 = arith.addf %27, %26 : vector<16x1xf32>
    %c0_8 = arith.constant 0 : index
    %c0_9 = arith.constant 0 : index
    %29 = vector.load %arg4[%c0_8, %c0_9] : memref<16x1xf32, #tpu.memory_space<vmem>>, vector<16x1xf32>
    tpu.vector_store %arg4[%c0_8, %c0_9], %28 {strides = array<i32>} : memref<16x1xf32, #tpu.memory_space<vmem>>, vector<16x1xf32>,
    %c0_i32_10 = arith.constant 0 : i32
    %30 = arith.cmpi eq, %arg1, %c0_i32_10 : i32
    %31 = arith.extui %30 : i1 to i32
    %c0_i32_11 = arith.constant 0 : i32
    %32 = arith.cmpi ne, %31, %c0_i32_11 : i32
    scf.if %32 {
      %c0_12 = arith.constant 0 : index
      %c0_13 = arith.constant 0 : index
      %33 = vector.load %arg4[%c0_12, %c0_13] : memref<16x1xf32, #tpu.memory_space<vmem>>, vector<16x1xf32>
      %34 = vector.shape_cast %33 : vector<16x1xf32> to vector<1x16x1xf32>
      %cst_14 = arith.constant dense<0.000000e+00> : vector<1xf32>
      %35 = vector.multi_reduction <add>, %34, %cst_14 [1, 2] : vector<1x16x1xf32> to vector<1xf32>
      %36 = vector.shape_cast %35 : vector<1xf32> to vector<1x1x1xf32>
      %37 = vector.extract %36[0, 0, 0] : f32 from vector<1x1x1xf32>
      %38 = vector.broadcast %37 : f32 to vector<1x8x128xf32>
      %c0_15 = arith.constant 0 : index
      %c0_16 = arith.constant 0 : index
      %c0_17 = arith.constant 0 : index
      %39 = vector.load %arg3[%c0_15, %c0_16, %c0_17] : memref<1x8x128xf32, #tpu.memory_space<vmem>>, vector<1x8x128xf32>
      tpu.vector_store %arg3[%c0_15, %c0_16, %c0_17], %38 {strides = array<i32>} : memref<1x8x128xf32, #tpu.memory_space<vmem>>, vector<1x8x128xf32>,
    } else {
    }
    return
  }
  func.func @transform_0(%arg0: i32, %arg1: i32) -> (i32, i32) {
    %c1_i32 = arith.constant 1 : i32
    %0 = arith.muli %arg0, %c1_i32 : i32
    %1 = arith.addi %0, %arg1 : i32
    %c0_i32 = arith.constant 0 : i32
    %2 = arith.minsi %1, %c0_i32 : i32
    %c0_i32_0 = arith.constant 0 : i32
    %c0_i32_1 = arith.constant 0 : i32
    return %2, %c0_i32_0 : i32, i32
  }
  func.func @transform_1(%arg0: i32, %arg1: i32) -> (i32, i32, i32) {
    %c0_i32 = arith.constant 0 : i32
    %c0_i32_0 = arith.constant 0 : i32
    %c0_i32_1 = arith.constant 0 : i32
    return %arg0, %c0_i32, %c0_i32_0 : i32, i32, i32
  }
}

</mosaic_0001>

<bundles_post_ra>
// kernel: tpu_custom_call.1
= control target key start
LH: loop header
LB: loop body
LE: loop exit
PB: predicated region body
PF: predicated region fallthrough
CT: control target
= control target key end

     0   :  { %6 = vsyncpa [#allocation4], 0  ;;  %s239_s0 = inlined_call_operand.hbm [shape: f32[16,128], index: 0, kind: input, shape index: {}]   ;;  %s240_s1 = inlined_call_operand.hbm [shape: f32[1,8,128], index: 1, kind: output, shape index: {}]  }
   0x1   :  { %7 = vsyncpa [#allocation5], 0  ;;  %s194_s6 = smov [#allocation3]   ;;  %s146_s10 = scalar_lea.hbm %s239_s0, 256 }
   0x2   :  { %s19_s7 = sshll.u32 %s194_s6, 4  ;;  %p147_p0 = scmp.ne.s32.totalorder %s239_s0, %s146_s10  ;;  %s20_s7 = int_to_ptr.vmem [resolvable:$true] %s19_s7 }
   0x3   :  { %p150_p1 = scmp.lt.u32.totalorder %s146_s10, %s239_s0 }
   0x5   :  { %p152_p2 = pnand %p150_p1, %p147_p0 }
   0x7   :  { %155 = shalt.err (!%p152_p2)
}
   0x8   :  { %s156_s15 = scalar_lea.vmem %s20_s7, 256  ;;  %p161_p4 = scmp.lt.s32.totalorder %s20_s7, %s20_s7 }
   0x9   :  { %p157_p3 = scmp.ne.s32.totalorder %s20_s7, %s156_s15  ;;  %p162_p5 = scmp.lt.s32.totalorder %s156_s15, %s156_s15 }
   0xb   :  { %p163_p6 = por %p162_p5, %p161_p4 }
   0xd   :  { %p164_p7 = pnand %p163_p6, %p157_p3 }
   0xf   :  { %167 = shalt.err (!%p164_p7)
}
  0x10   :  { %s195_s16 = smov 128   ;;  %s196_s17 = smov 8  }
  0x11   :  { %25 = dma.hbm_to_vmem [thread:$0]  %s239_s0, 256, %s20_s7, [#allocation4], %s195_s16, %s195_s16, %s196_s17  }
  0x12   :  { %190 = dma.done.wait [#allocation4], 256  }
  0x13   :  { %191 = vsyncadd [#allocation4], 4294967040  ;;  %v40_v0 = vld [vmem:[#allocation3] sm:$0xff]  ;;  %v41_v1 = vld [vmem:[#allocation3 + $0x8] sm:$0xff]  ;;  %vm37_vm0 = vcmask 7168   ;;  %v197_v12 = vmov 0.0  }
  0x14   :  { %42 = vmax.xlane.f32.xlu0 %v40_v0  ;;  %38 = vst.msk [vmem:[#allocation2] sm:$0xff] %vm37_vm0, %v197_v12  ;;  %39 = vst.msk [vmem:[#allocation2 + $0x8] sm:$0xff] %vm37_vm0, %v197_v12  ;;  %s198_s0 = smov [#allocation6]  }
  0x15   :  { %s116_s20 = sshll.u32 %s198_s0, 4  ;;  %s117_s20 = int_to_ptr.vmem [resolvable:$true] %s116_s20 }
  0x16   :  { %s168_s22 = scalar_lea.vmem %s117_s20, 128  ;;  %p173_p9 = scmp.lt.s32.totalorder %s117_s20, %s117_s20 }
  0x17   :  { %p169_p8 = scmp.ne.s32.totalorder %s117_s20, %s168_s22  ;;  %p174_p10 = scmp.lt.s32.totalorder %s168_s22, %s168_s22 }
  0x18   :  { %44 = vmax.xlane.f32.xlu0 %v41_v1 }
  0x19   :  { %p175_p11 = por %p174_p10, %p173_p9 }
  0x1b   :  { %v84_v20 = vld [vmem:[#allocation2] sm:$0xff]  ;;  %v85_v28 = vld [vmem:[#allocation2 + $0x8] sm:$0xff]  ;;  %p176_p12 = pnand %p175_p11, %p169_p8 }
  0xa1   :  { %v43_v2 = vpop.xlane.xlu0 %42 }
  0xa2   :  { %v46_v3 = vsub.f32 %v40_v0, %v43_v2 }
  0xa4   :  { %v48_v4 = vmul.f32 1.442695, %v46_v3 }
  0xa5   :  { %v45_v5 = vpop.xlane.xlu0 %44 }
  0xa6   :  { %134 = vpow2.f32 %v48_v4  ;;  %v47_v6 = vsub.f32 %v41_v1, %v45_v5 }
  0xa8   :  { %v50_v7 = vmul.f32 1.442695, %v47_v6 }
  0xaa   :  { %136 = vpow2.f32 %v50_v7 }
  0xb0   :  { %v135_v8 = vpop.eup %134 }
  0xb1   :  { %52 = vadd.xlane.f32.xlu1 %v135_v8  ;;  %v56_v9 = vmul.f32 %v135_v8, %v46_v3 }
  0xb3   :  { %58 = vadd.xlane.f32.xlu0 %v56_v9 }
  0xb4   :  { %v137_v10 = vpop.eup %136 }
  0xb5   :  { %54 = vadd.xlane.f32.xlu1 %v137_v10  ;;  %v57_v11 = vmul.f32 %v137_v10, %v47_v6 }
  0xb9   :  { %60 = vadd.xlane.f32.xlu1 %v57_v11 }
 0x13e   :  { %v53_v13 = vpop.xlane.xlu1 %52 }
 0x13f   :  { %138 = vlog2.f32 %v53_v13 }
 0x140   :  { %140 = vrcp.f32 %v53_v13  ;;  %v59_v18 = vpop.xlane.xlu0 %58 }
 0x142   :  { %v55_v14 = vpop.xlane.xlu1 %54 }
 0x143   :  { %142 = vlog2.f32 %v55_v14 }
 0x144   :  { %144 = vrcp.f32 %v55_v14 }
 0x146   :  { %v61_v25 = vpop.xlane.xlu1 %60 }
 0x149   :  { %v139_v15 = vpop.eup %138 }
 0x14a   :  { %v141_v16 = vpop.eup %140  ;;  %v63_v17 = vmul.f32 0.6931472, %v139_v15 }
 0x14b   :  { %v67_v19 = vmul.f32 %v141_v16, %v59_v18 }
 0x14d   :  { %v143_v21 = vpop.eup %142  ;;  %v70_v22 = vsub.f32 %v63_v17, %v67_v19 }
 0x14e   :  { %v145_v23 = vpop.eup %144  ;;  %v65_v24 = vmul.f32 0.6931472, %v143_v21 }
 0x14f   :  { %v86_v26 = vadd.f32 %v84_v20, %v70_v22  ;;  %v69_v27 = vmul.f32 %v145_v23, %v61_v25 }
 0x151   :  { %89 = vst.msk [vmem:[#allocation2] sm:$0xff] %vm37_vm0, %v86_v26  ;;  %v71_v29 = vsub.f32 %v65_v24, %v69_v27 }
 0x153   :  { %v87_v30 = vadd.f32 %v85_v28, %v71_v29 }
 0x155   :  { %90 = vst.msk [vmem:[#allocation2 + $0x8] sm:$0xff] %vm37_vm0, %v87_v30 }
 0x158   :  { %v94_v31 = vld [vmem:[#allocation2] sm:$0xff] }
 0x159   :  { %v96_v33 = vsel %vm37_vm0, %v94_v31, 0.0 }
 0x15c   :  { %v95_v32 = vld [vmem:[#allocation2 + $0x8] sm:$0xff] }
 0x15d   :  { %v97_v34 = vsel %vm37_vm0, %v95_v32, 0.0 }
 0x15e   :  { %v98_v35 = vadd.f32 %v97_v34, %v96_v33 }
 0x160   :  { %99 = vadd.xlane.f32.xlu0 %v98_v35 }
 0x1ed   :  { %v100_v36 = vpop.xlane.xlu0 %99 }
 0x1ee   :  { %v101_v37 = vrot.slane %v100_v36, 4 }
 0x1f0   :  { %v102_v38 = vadd.f32 %v101_v37, %v100_v36 }
 0x1f2   :  { %v103_v39 = vrot.slane %v102_v38, 2 }
 0x1f4   :  { %v104_v40 = vadd.f32 %v103_v39, %v102_v38 }
 0x1f6   :  { %v105_v41 = vrot.slane %v104_v40, 1 }
 0x1f8   :  { %v106_v42 = vadd.f32 %v105_v41, %v104_v40 }
 0x1fa   :  { %127 = vpush %v106_v42 }
 0x22b   :  { %s128_s21 = spop %127 }
 0x22c   :  { %v108_v43 = vstv %s128_s21 }
 0x22d   :  { %109 = vst [vmem:[#allocation6] sm:$0xff] %v108_v43 }
 0x22e   :  { %179 = shalt.err (!%p176_p12)
}
 0x22f   :  { %s180_s25 = scalar_lea.hbm %s240_s1, 128 }
 0x230   :  { %p181_p13 = scmp.ne.s32.totalorder %s240_s1, %s180_s25  ;;  %p184_p0 = scmp.lt.u32.totalorder %s180_s25, %s240_s1 }
 0x232   :  { %p186_p1 = pnand %p184_p0, %p181_p13 }
 0x234   :  { %189 = shalt.err (!%p186_p1)
}
 0x235   :  { %119 = dma.vmem_to_hbm [thread:$0]  %s117_s20, 128, %s240_s1, [#allocation5]  }
 0x236   :  { %192 = dma.done.wait [#allocation5], 128  }
 0x237   :  { %193 = vsyncadd [#allocation5], 4294967168 }
 0x238   :  { %123 = vsyncpa [#allocation4], 1 }
 0x239   :  { %124 = vsyncpa [#allocation5], 1 }

</bundles_post_ra>
